<compile_context>
chip_gen: v7x
topology: tpu7x:2x2x1
jax: 0.10.0
libtpu: 0.0.40
codegen_flags: <defaults>
</compile_context>

<pallas_src>
import jax
import jax.numpy as jnp
from jax.experimental import pallas as pl
from jax.experimental.pallas import tpu as pltpu


def _round_up(x, m):
    return (x + m - 1) // m * m


def _tpu_caps():
    """(usable VMEM budget in bytes, use CORE_PARALLEL?) for the local TPU."""
    kind = ""
    try:
        devs = jax.devices()
        if devs:
            kind = getattr(devs[0], "device_kind", "").lower()
    except Exception:
        pass
    if "v7" in kind or "7x" in kind:
        # 64 MiB physical VMEM per TensorCore on v7x -> leave headroom; 2 TCs.
        return 40 << 20, True
    if "v5 lite" in kind or "v5e" in kind or "v5litepod" in kind:
        # 128 MiB physical, 16 MiB default scoped limit (raised explicitly).
        return 64 << 20, False
    # v4 / v5p / v6e: 128 MiB physical VMEM per core.
    return 80 << 20, False


def _make_adapter_kernel(layer_counts):
    """Fused kernel for several gated-residual MLP adapter branches.

    Ref order:
        x_0 ... x_{n-1}                        (TB, D_i) activation tiles
        per branch, flattened: w_1, b_1, ...   w: (D_i, D_i) bf16 (= W.T),
                                               b: (1, D_i) f32
        gates_ref                              SMEM (n,) f32, post-sigmoid gates
        out_0 ... out_{n-1}                    (TB, D_i)

    Each branch computes h = MLP(x) (Linear+ReLU * (L-1), then Linear) and
    out = x + (1 - r) * (h - x)  ==  r * x + (1 - r) * h   (torch semantics).
    """
    n = len(layer_counts)
    total_params = 2 * sum(layer_counts)

    def kernel(*refs):
        x_refs = refs[:n]
        p_refs = refs[n:n + total_params]
        gates_ref = refs[n + total_params]
        out_refs = refs[n + total_params + 1:]

        p_off = 0
        for bi, num_layers in enumerate(layer_counts):
            x32 = x_refs[bi][...].astype(jnp.float32)
            h = x32
            for l in range(num_layers):
                w = p_refs[p_off + 2 * l][...]            # (D, D) bf16  (W.T)
                b = p_refs[p_off + 2 * l + 1][...]        # (1, D) f32
                # bf16 x bf16 on the MXU, f32 accumulation.
                h = jnp.dot(h.astype(w.dtype), w,
                            preferred_element_type=jnp.float32) + b
                if l < num_layers - 1:
                    h = jnp.maximum(h, 0.0)               # ReLU on all but last
            p_off += 2 * num_layers

            r = gates_ref[bi]                             # scalar from SMEM
            out_refs[bi][...] = (x32 + (1.0 - r) * (h - x32)).astype(
                out_refs[bi].dtype)

    return kernel


def _run_branch_group(xs, params, *, tile_b):
    """One fused, batch-tiled pallas_call for branches sharing a batch size."""
    n = len(xs)
    B = xs[0].shape[0]

    # dtype-aware sublane minimum (8 rows f32, 16 bf16, 32 int8/fp8).
    sublane = 8
    for x in xs:
        sublane = max(sublane, 32 // max(1, x.dtype.itemsize))

    vmem_cap, core_parallel = _tpu_caps()

    def vmem_estimate(tb_):
        total = 2 << 20                            # slack for compiler scratch
        for x, (ws, bs, _) in zip(xs, params):
            d = x.shape[1]
            act = tb_ * d * x.dtype.itemsize
            total += 4 * act                       # in + out tiles, double-buffered
            total += 2 * tb_ * d * 4               # f32 intermediates
            for w in ws:
                total += 2 * w.size * w.dtype.itemsize            # weights
            for b in bs:
                total += 2 * 8 * _round_up(b.shape[-1], 128) * 4  # padded biases
        return total

    tb = _round_up(min(tile_b, B), sublane)
    while tb > sublane and 2 * vmem_estimate(tb) > vmem_cap:
        tb = max(sublane, _round_up(tb // 2, sublane))

    grid = (pl.cdiv(B, tb),)
    layer_counts = tuple(len(ws) for ws, _, _ in params)
    kernel = _make_adapter_kernel(layer_counts)

    x_args, x_specs, p_args, gate_vals = [], [], [], []
    for x, (ws, bs, rw) in zip(xs, params):
        if rw is None:
            raise ValueError("adapter branch with layers > 0 must have a "
                             "residual gate parameter")
        d = x.shape[1]
        x_args.append(x)
        x_specs.append(pl.BlockSpec((tb, d), lambda g: (g, 0)))
        for w_t, b in zip(ws, bs):
            p_args.append(jnp.asarray(w_t))                            # (D,D) bf16
            p_args.append(jnp.asarray(b, jnp.float32).reshape(1, -1))  # (1,D) f32
        gate_vals.append(jnp.asarray(rw, jnp.float32))
    # Post-sigmoid residual gates on the scalar path (SMEM).
    gates = jax.nn.sigmoid(jnp.stack(gate_vals))

    out_shape = tuple(jax.ShapeDtypeStruct((B, x.shape[1]), x.dtype) for x in xs)
    out_specs = tuple(pl.BlockSpec((tb, x.shape[1]), lambda g: (g, 0)) for x in xs)

    # Advisory cost estimate so XLA schedules neighbours around the call.
    flops, bytes_acc = 0, 0
    for x, (ws, bs, _) in zip(xs, params):
        bi, d = x.shape
        flops += 2 * d * d * len(ws) * bi + 4 * bi * d
        bytes_acc += 2 * bi * d * x.dtype.itemsize
        for w in ws:
            bytes_acc += w.size * w.dtype.itemsize
        for b in bs:
            bytes_acc += b.size * 4
    cost = pl.CostEstimate(flops=int(flops), transcendentals=0,
                           bytes_accessed=int(bytes_acc))

    sem = "parallel"
    if core_parallel and grid[0] > 1:
        sem = getattr(pltpu, "CORE_PARALLEL", "parallel")   # v7x: both TCs
    vmem_limit = int(min(vmem_cap, max(32 << 20, 2 * vmem_estimate(tb))))
    cparams = pltpu.CompilerParams(dimension_semantics=(sem,),
                                   vmem_limit_bytes=vmem_limit)

    def build(weight_mode):
        kw = {} if weight_mode is None else {"pipeline_mode": weight_mode}
        p_specs = []
        for x, (ws, bs, _) in zip(xs, params):
            d = x.shape[1]
            for _ in ws:
                # Constant index_map => VMEM-resident across all grid steps;
                # single-buffered when Buffered(1) is supported.
                p_specs.append(pl.BlockSpec((d, d), lambda g: (0, 0), **kw))
                p_specs.append(pl.BlockSpec((1, d), lambda g: (0, 0), **kw))
        return pl.pallas_call(
            kernel,
            out_shape=out_shape,
            grid=grid,
            in_specs=x_specs + p_specs
            + [pl.BlockSpec(memory_space=pltpu.MemorySpace.SMEM)],
            out_specs=out_specs,
            compiler_params=cparams,
            cost_estimate=cost,
        )

    buffered = getattr(pl, "Buffered", None)
    try:
        results = build(buffered(1) if buffered is not None else None)(
            *x_args, *p_args, gates)
    except Exception:
        # Fallback: default double-buffering for the (tiny) resident weights.
        results = build(None)(*x_args, *p_args, gates)

    if not isinstance(results, (tuple, list)):
        results = (results,)
    return list(results)


def adapter_head_forward(xs, branch_params, *, tile_b=1024):
    """Run all adapter branches; fused per batch-size group, no padding copies.

    xs:            list of (B_i, D_i) feature arrays (one per branch).
    branch_params: list of (weights_t, biases, residual_weight) per branch.
                   weights_t: list of (D_i, D_i) bf16 arrays (already W.T)
                   biases:    list of (1, D_i) or (D_i,) f32 arrays
                   residual_weight: scalar (pre-sigmoid) or None (identity)
    """
    outs = [None] * len(xs)
    active = [i for i, (ws, _, _) in enumerate(branch_params) if len(ws) > 0]
    for i in range(len(xs)):
        if i not in active:
            outs[i] = xs[i]           # Identity branch, as in the torch module.
    if not active:
        return outs

    groups = {}
    for i in active:
        groups.setdefault(xs[i].shape[0], []).append(i)
    for _, idxs in groups.items():
        res = _run_branch_group([xs[i] for i in idxs],
                                [branch_params[i] for i in idxs],
                                tile_b=tile_b)
        for j, i in enumerate(idxs):
            outs[i] = res[j]
    return outs


class AdapterHead:
    """JAX/Pallas port of mineclip_official.modules.AdapterHead."""

    def __init__(self, video_adapter_layers, text_adapter_layers, feature_dim,
                 key, *, tile_b=1024, weight_dtype=jnp.bfloat16):
        self.video_adapter_layers = video_adapter_layers
        self.text_adapter_layers = text_adapter_layers
        self.feature_dim = feature_dim
        self.tile_b = tile_b

        def init_mlp(num_layers, key):
            ws, bs = [], []
            bound = 1.0 / jnp.sqrt(feature_dim)
            for _ in range(num_layers):
                key, kw, kb = jax.random.split(key, 3)
                w = jax.random.uniform(
                    kw, (feature_dim, feature_dim), jnp.float32, -bound, bound)
                b = jax.random.uniform(kb, (feature_dim,), jnp.float32,
                                       -bound, bound)
                ws.append(w.T.astype(weight_dtype))      # store W.T for the MXU
                bs.append(b.reshape(1, feature_dim))     # biases stay f32
            return ws, bs

        key_v, key_t = jax.random.split(key)
        self.video_weights_t, self.video_biases = init_mlp(
            video_adapter_layers, key_v)
        self.text_weights_t, self.text_biases = init_mlp(
            text_adapter_layers, key_t)
        self.video_residual_weight = (
            jnp.float32(4.0) if video_adapter_layers > 0 else None)
        self.text_residual_weight = (
            jnp.float32(4.0) if text_adapter_layers > 0 else None)

    def __call__(self, video_features, text_features):
        outs = adapter_head_forward(
            [video_features, text_features],
            [(self.video_weights_t, self.video_biases, self.video_residual_weight),
             (self.text_weights_t, self.text_biases, self.text_residual_weight)],
            tile_b=self.tile_b,
        )
        return outs[0], outs[1]

    # Pure-JAX reference (same bf16-weight / f32-accumulate math).
    def reference(self, video_features, text_features):
        def branch(x, ws, bs, rw):
            if len(ws) == 0:
                return x
            h = x.astype(jnp.float32)
            for i, (w, b) in enumerate(zip(ws, bs)):
                h = jnp.dot(h.astype(w.dtype), w,
                            preferred_element_type=jnp.float32) + b
                if i < len(ws) - 1:
                    h = jnp.maximum(h, 0.0)
            r = jax.nn.sigmoid(jnp.float32(rw))
            x32 = x.astype(jnp.float32)
            return (x32 + (1.0 - r) * (h - x32)).astype(x.dtype)

        return (
            branch(video_features, self.video_weights_t, self.video_biases,
                   self.video_residual_weight),
            branch(text_features, self.text_weights_t, self.text_biases,
                   self.text_residual_weight),
        )


if __name__ == "__main__":
    key = jax.random.PRNGKey(0)
    k_params, k_vid, k_txt = jax.random.split(key, 3)

    D = 128                       # feature_dim (lane-aligned)
    B_video, B_text = 20, 16      # mismatched + non-multiple-of-8 video batch

    # tile_b=8 at these tiny shapes so the kernel actually runs a multi-step,
    # masked-tail, batch-tiled pipeline; production default is 1024.
    head = AdapterHead(2, 1, D, k_params, tile_b=8)

    video_features = jax.random.normal(k_vid, (B_video, D), jnp.float32)
    text_features = jax.random.normal(k_txt, (B_text, D), jnp.float32)

    # Mismatched batches -> one call per branch, each with its true (B_i, D)
    # output (no pad/slice copies); the video grid has a masked partial tail.
    adapted_video, adapted_text = head(video_features, text_features)
    adapted_video = jax.block_until_ready(adapted_video)
    adapted_text = jax.block_until_ready(adapted_text)

    ref_video, ref_text = head.reference(video_features, text_features)
    assert adapted_video.shape == (B_video, D)
    assert adapted_text.shape == (B_text, D)
    assert jnp.allclose(adapted_video, ref_video, atol=1e-3, rtol=1e-3)
    assert jnp.allclose(adapted_text, ref_text, atol=1e-3, rtol=1e-3)

    # Equal batches -> both branches fused into a single pallas_call.
    av_eq, at_eq = head(video_features[:B_text], text_features)
    av_eq = jax.block_until_ready(av_eq)
    at_eq = jax.block_until_ready(at_eq)
    ref_v_eq, ref_t_eq = head.reference(video_features[:B_text], text_features)
    assert jnp.allclose(av_eq, ref_v_eq, atol=1e-3, rtol=1e-3)
    assert jnp.allclose(at_eq, ref_t_eq, atol=1e-3, rtol=1e-3)

    # Single-active-branch + Identity path (text_layers == 0).
    head2 = AdapterHead(1, 0, D, k_params, tile_b=8)
    av2, at2 = head2(video_features, text_features)
    av2 = jax.block_until_ready(av2)
    at2 = jax.block_until_ready(at2)
    ref_v2, ref_t2 = head2.reference(video_features, text_features)
    assert jnp.allclose(av2, ref_v2, atol=1e-3, rtol=1e-3)
    assert jnp.array_equal(at2, text_features)   # Identity branch passthrough

    print("KERNEL_OK")
</pallas_src>

<mosaic_0001>
module attributes {stable_mosaic.version = 11 : i64} {
  func.func @kernel(%arg0: i32, %arg1: memref<8x128xf32, #tpu.memory_space<vmem>>, %arg2: memref<128x128xbf16, #tpu.memory_space<vmem>>, %arg3: memref<1x128xf32, #tpu.memory_space<vmem>>, %arg4: memref<128x128xbf16, #tpu.memory_space<vmem>>, %arg5: memref<1x128xf32, #tpu.memory_space<vmem>>, %arg6: memref<1xf32, #tpu.memory_space<smem>>, %arg7: memref<8x128xf32, #tpu.memory_space<vmem>>) attributes {dimension_semantics = [#tpu.dimension_semantics<parallel>], iteration_bounds = array<i64: 3>, scalar_prefetch = 0 : i64, scratch_operands = 0 : i64, tpu.core_type = #tpu.core_type<tc>, window_params = [{transform_indices = @transform_0, window_bounds = array<i64: 8, 128>}, {pipeline_mode = #tpu.pipeline_mode<synchronous>, transform_indices = @transform_1, window_bounds = array<i64: 128, 128>}, {pipeline_mode = #tpu.pipeline_mode<synchronous>, transform_indices = @transform_2, window_bounds = array<i64: 1, 128>}, {pipeline_mode = #tpu.pipeline_mode<synchronous>, transform_indices = @transform_3, window_bounds = array<i64: 128, 128>}, {pipeline_mode = #tpu.pipeline_mode<synchronous>, transform_indices = @transform_4, window_bounds = array<i64: 1, 128>}, {transform_indices = @transform_5, window_bounds = array<i64: 1>}, {transform_indices = @transform_6, window_bounds = array<i64: 8, 128>}]} {
    %c0 = arith.constant 0 : index
    %c0_0 = arith.constant 0 : index
    %0 = vector.load %arg1[%c0, %c0_0] : memref<8x128xf32, #tpu.memory_space<vmem>>, vector<8x128xf32>
    %c0_1 = arith.constant 0 : index
    %c0_2 = arith.constant 0 : index
    %1 = vector.load %arg2[%c0_1, %c0_2] : memref<128x128xbf16, #tpu.memory_space<vmem>>, vector<128x128xbf16>
    %c0_3 = arith.constant 0 : index
    %c0_4 = arith.constant 0 : index
    %2 = vector.load %arg3[%c0_3, %c0_4] : memref<1x128xf32, #tpu.memory_space<vmem>>, vector<1x128xf32>
    %3 = arith.truncf %0 : vector<8x128xf32> to vector<8x128xbf16>
    %cst = arith.constant dense<0.000000e+00> : vector<8x128xf32>
    %4 = tpu.matmul %3, %1, %cst {dimension_numbers = #tpu.dot_dimension_numbers<[1], [0], [0], [1], [0, 0, 1, 1], [], []>} : vector<8x128xbf16>, vector<128x128xbf16>, vector<8x128xf32> -> vector<8x128xf32>
    %5 = vector.broadcast %2 : vector<1x128xf32> to vector<8x128xf32>
    %6 = arith.addf %4, %5 : vector<8x128xf32>
    %cst_5 = arith.constant 0.000000e+00 : f32
    %7 = vector.broadcast %cst_5 : f32 to vector<8x128xf32>
    %8 = arith.maximumf %6, %7 : vector<8x128xf32>
    %c0_6 = arith.constant 0 : index
    %c0_7 = arith.constant 0 : index
    %9 = vector.load %arg4[%c0_6, %c0_7] : memref<128x128xbf16, #tpu.memory_space<vmem>>, vector<128x128xbf16>
    %c0_8 = arith.constant 0 : index
    %c0_9 = arith.constant 0 : index
    %10 = vector.load %arg5[%c0_8, %c0_9] : memref<1x128xf32, #tpu.memory_space<vmem>>, vector<1x128xf32>
    %11 = arith.truncf %8 : vector<8x128xf32> to vector<8x128xbf16>
    %cst_10 = arith.constant dense<0.000000e+00> : vector<8x128xf32>
    %12 = tpu.matmul %11, %9, %cst_10 {dimension_numbers = #tpu.dot_dimension_numbers<[1], [0], [0], [1], [0, 0, 1, 1], [], []>} : vector<8x128xbf16>, vector<128x128xbf16>, vector<8x128xf32> -> vector<8x128xf32>
    %13 = vector.broadcast %10 : vector<1x128xf32> to vector<8x128xf32>
    %14 = arith.addf %12, %13 : vector<8x128xf32>
    %c0_11 = arith.constant 0 : index
    %15 = memref.load %arg6[%c0_11] : memref<1xf32, #tpu.memory_space<smem>>
    %cst_12 = arith.constant 1.000000e+00 : f32
    %16 = arith.subf %cst_12, %15 : f32
    %17 = arith.subf %14, %0 : vector<8x128xf32>
    %18 = vector.broadcast %16 : f32 to vector<8x128xf32>
    %19 = arith.mulf %18, %17 : vector<8x128xf32>
    %20 = arith.addf %0, %19 : vector<8x128xf32>
    %c0_13 = arith.constant 0 : index
    %c0_14 = arith.constant 0 : index
    %21 = vector.load %arg7[%c0_13, %c0_14] : memref<8x128xf32, #tpu.memory_space<vmem>>, vector<8x128xf32>
    tpu.vector_store %arg7[%c0_13, %c0_14], %20 {strides = array<i32>} : memref<8x128xf32, #tpu.memory_space<vmem>>, vector<8x128xf32>,
    return
  }
  func.func @transform_0(%arg0: i32) -> (i32, i32) {
    %c0_i32 = arith.constant 0 : i32
    %c0_i32_0 = arith.constant 0 : i32
    return %arg0, %c0_i32 : i32, i32
  }
  func.func @transform_1(%arg0: i32) -> (i32, i32) {
    %c0_i32 = arith.constant 0 : i32
    %c0_i32_0 = arith.constant 0 : i32
    %c0_i32_1 = arith.constant 0 : i32
    return %c0_i32, %c0_i32_0 : i32, i32
  }
  func.func @transform_2(%arg0: i32) -> (i32, i32) {
    %c0_i32 = arith.constant 0 : i32
    %c0_i32_0 = arith.constant 0 : i32
    %c0_i32_1 = arith.constant 0 : i32
    return %c0_i32, %c0_i32_0 : i32, i32
  }
  func.func @transform_3(%arg0: i32) -> (i32, i32) {
    %c0_i32 = arith.constant 0 : i32
    %c0_i32_0 = arith.constant 0 : i32
    %c0_i32_1 = arith.constant 0 : i32
    return %c0_i32, %c0_i32_0 : i32, i32
  }
  func.func @transform_4(%arg0: i32) -> (i32, i32) {
    %c0_i32 = arith.constant 0 : i32
    %c0_i32_0 = arith.constant 0 : i32
    %c0_i32_1 = arith.constant 0 : i32
    return %c0_i32, %c0_i32_0 : i32, i32
  }
  func.func @transform_5(%arg0: i32) -> i32 {
    %c0_i32 = arith.constant 0 : i32
    %c0_i32_0 = arith.constant 0 : i32
    return %c0_i32 : i32
  }
  func.func @transform_6(%arg0: i32) -> (i32, i32) {
    %c0_i32 = arith.constant 0 : i32
    %c0_i32_0 = arith.constant 0 : i32
    return %arg0, %c0_i32 : i32, i32
  }
}

module attributes {stable_mosaic.version = 11 : i64} {
  func.func @kernel(%arg0: i32, %arg1: memref<8x128xf32, #tpu.memory_space<vmem>>, %arg2: memref<128x128xbf16, #tpu.memory_space<vmem>>, %arg3: memref<1x128xf32, #tpu.memory_space<vmem>>, %arg4: memref<128x128xbf16, #tpu.memory_space<vmem>>, %arg5: memref<1x128xf32, #tpu.memory_space<vmem>>, %arg6: memref<1xf32, #tpu.memory_space<smem>>, %arg7: memref<8x128xf32, #tpu.memory_space<vmem>>) attributes {dimension_semantics = [#tpu.dimension_semantics<parallel>], iteration_bounds = array<i64: 3>, scalar_prefetch = 0 : i64, scratch_operands = 0 : i64, tpu.core_type = #tpu.core_type<tc>, window_params = [{transform_indices = @transform_0, window_bounds = array<i64: 8, 128>}, {pipeline_mode = #tpu.pipeline_mode<synchronous>, transform_indices = @transform_1, window_bounds = array<i64: 128, 128>}, {pipeline_mode = #tpu.pipeline_mode<synchronous>, transform_indices = @transform_2, window_bounds = array<i64: 1, 128>}, {pipeline_mode = #tpu.pipeline_mode<synchronous>, transform_indices = @transform_3, window_bounds = array<i64: 128, 128>}, {pipeline_mode = #tpu.pipeline_mode<synchronous>, transform_indices = @transform_4, window_bounds = array<i64: 1, 128>}, {transform_indices = @transform_5, window_bounds = array<i64: 1>}, {transform_indices = @transform_6, window_bounds = array<i64: 8, 128>}]} {
    %c0 = arith.constant 0 : index
    %c0_0 = arith.constant 0 : index
    %0 = vector.load %arg1[%c0, %c0_0] : memref<8x128xf32, #tpu.memory_space<vmem>>, vector<8x128xf32>
    %c0_1 = arith.constant 0 : index
    %c0_2 = arith.constant 0 : index
    %1 = vector.load %arg2[%c0_1, %c0_2] : memref<128x128xbf16, #tpu.memory_space<vmem>>, vector<128x128xbf16>
    %c0_3 = arith.constant 0 : index
    %c0_4 = arith.constant 0 : index
    %2 = vector.load %arg3[%c0_3, %c0_4] : memref<1x128xf32, #tpu.memory_space<vmem>>, vector<1x128xf32>
    %3 = arith.truncf %0 : vector<8x128xf32> to vector<8x128xbf16>
    %cst = arith.constant dense<0.000000e+00> : vector<8x128xf32>
    %4 = tpu.matmul %3, %1, %cst {dimension_numbers = #tpu.dot_dimension_numbers<[1], [0], [0], [1], [0, 0, 1, 1], [], []>} : vector<8x128xbf16>, vector<128x128xbf16>, vector<8x128xf32> -> vector<8x128xf32>
    %5 = vector.broadcast %2 : vector<1x128xf32> to vector<8x128xf32>
    %6 = arith.addf %4, %5 : vector<8x128xf32>
    %cst_5 = arith.constant 0.000000e+00 : f32
    %7 = vector.broadcast %cst_5 : f32 to vector<8x128xf32>
    %8 = arith.maximumf %6, %7 : vector<8x128xf32>
    %c0_6 = arith.constant 0 : index
    %c0_7 = arith.constant 0 : index
    %9 = vector.load %arg4[%c0_6, %c0_7] : memref<128x128xbf16, #tpu.memory_space<vmem>>, vector<128x128xbf16>
    %c0_8 = arith.constant 0 : index
    %c0_9 = arith.constant 0 : index
    %10 = vector.load %arg5[%c0_8, %c0_9] : memref<1x128xf32, #tpu.memory_space<vmem>>, vector<1x128xf32>
    %11 = arith.truncf %8 : vector<8x128xf32> to vector<8x128xbf16>
    %cst_10 = arith.constant dense<0.000000e+00> : vector<8x128xf32>
    %12 = tpu.matmul %11, %9, %cst_10 {dimension_numbers = #tpu.dot_dimension_numbers<[1], [0], [0], [1], [0, 0, 1, 1], [], []>} : vector<8x128xbf16>, vector<128x128xbf16>, vector<8x128xf32> -> vector<8x128xf32>
    %13 = vector.broadcast %10 : vector<1x128xf32> to vector<8x128xf32>
    %14 = arith.addf %12, %13 : vector<8x128xf32>
    %c0_11 = arith.constant 0 : index
    %15 = memref.load %arg6[%c0_11] : memref<1xf32, #tpu.memory_space<smem>>
    %cst_12 = arith.constant 1.000000e+00 : f32
    %16 = arith.subf %cst_12, %15 : f32
    %17 = arith.subf %14, %0 : vector<8x128xf32>
    %18 = vector.broadcast %16 : f32 to vector<8x128xf32>
    %19 = arith.mulf %18, %17 : vector<8x128xf32>
    %20 = arith.addf %0, %19 : vector<8x128xf32>
    %c0_13 = arith.constant 0 : index
    %c0_14 = arith.constant 0 : index
    %21 = vector.load %arg7[%c0_13, %c0_14] : memref<8x128xf32, #tpu.memory_space<vmem>>, vector<8x128xf32>
    tpu.vector_store %arg7[%c0_13, %c0_14], %20 {strides = array<i32>} : memref<8x128xf32, #tpu.memory_space<vmem>>, vector<8x128xf32>,
    return
  }
  func.func @transform_0(%arg0: i32) -> (i32, i32) {
    %c0_i32 = arith.constant 0 : i32
    %c0_i32_0 = arith.constant 0 : i32
    return %arg0, %c0_i32 : i32, i32
  }
  func.func @transform_1(%arg0: i32) -> (i32, i32) {
    %c0_i32 = arith.constant 0 : i32
    %c0_i32_0 = arith.constant 0 : i32
    %c0_i32_1 = arith.constant 0 : i32
    return %c0_i32, %c0_i32_0 : i32, i32
  }
  func.func @transform_2(%arg0: i32) -> (i32, i32) {
    %c0_i32 = arith.constant 0 : i32
    %c0_i32_0 = arith.constant 0 : i32
    %c0_i32_1 = arith.constant 0 : i32
    return %c0_i32, %c0_i32_0 : i32, i32
  }
  func.func @transform_3(%arg0: i32) -> (i32, i32) {
    %c0_i32 = arith.constant 0 : i32
    %c0_i32_0 = arith.constant 0 : i32
    %c0_i32_1 = arith.constant 0 : i32
    return %c0_i32, %c0_i32_0 : i32, i32
  }
  func.func @transform_4(%arg0: i32) -> (i32, i32) {
    %c0_i32 = arith.constant 0 : i32
    %c0_i32_0 = arith.constant 0 : i32
    %c0_i32_1 = arith.constant 0 : i32
    return %c0_i32, %c0_i32_0 : i32, i32
  }
  func.func @transform_5(%arg0: i32) -> i32 {
    %c0_i32 = arith.constant 0 : i32
    %c0_i32_0 = arith.constant 0 : i32
    return %c0_i32 : i32
  }
  func.func @transform_6(%arg0: i32) -> (i32, i32) {
    %c0_i32 = arith.constant 0 : i32
    %c0_i32_0 = arith.constant 0 : i32
    return %arg0, %c0_i32 : i32, i32
  }
}

</mosaic_0001>

<bundles_post_ra>
// kernel: tpu_custom_call.1
= control target key start
LH: loop header
LB: loop body
LE: loop exit
PB: predicated region body
PF: predicated region fallthrough
CT: control target
= control target key end

     0   :  { %s1250_s0 = inlined_call_operand.hbm [shape: f32[20,128], index: 0, kind: input, shape index: {}]   ;;  %s1251_s1 = inlined_call_operand.hbm [shape: bf16[128,128], index: 1, kind: input, shape index: {}]   ;;  %s1252_s2 = inlined_call_operand.vmem [shape: f32[1,128], index: 2, kind: input, shape index: {}]   ;;  %s1253_s3 = inlined_call_operand.hbm [shape: bf16[128,128], index: 3, kind: input, shape index: {}]   ;;  %s1254_s4 = inlined_call_operand.vmem [shape: f32[1,128], index: 4, kind: input, shape index: {}]   ;;  %s1255_s5 = inlined_call_operand.<no memory space> [shape: f32[1], index: 5, kind: input, shape index: {}]   ;;  %s1256_s6 = inlined_call_operand.hbm [shape: f32[20,128], index: 6, kind: output, shape index: {}]  }
   0x1   :  { %11 = sst [smem:[#allocation2]] %s1255_s5 }
   0x2   :  { %12 = vsyncpa [#allocation4], 0 }
   0x3   :  { %14 = vsyncpa [#allocation4 + $0x1], 0 }
   0x4   :  { %15 = vsyncpa [#allocation7], 0 }
   0x5   :  { %16 = vsyncpa [#allocation5], 0 }
   0x6   :  { %18 = vsyncpa [#allocation5 + $0x1], 0  ;;  %s1017_s23 = smov 0   ;;  %s1019_s24 = smov 0  }
   0x7   :  { %s1021_s25 = smov 0   ;;  %s1023_s26 = smov 0  }
   0x8 LB: > { %s1038_s5 = sadd.s32 4294967295, %s969_s26   ;;  %s634_s27 = sadd.s32 4294967294, %s969_s26   ;;  %s969_s26 = sphi %s1023_s26, %s1275_s26   ;;  %s965_s25 = sphi %s1021_s25, %s1274_s25   ;;  %s961_s24 = sphi %s1019_s24, %s1273_s24   ;;  %s957_s23 = sphi %s1017_s23, %s1272_s23  }
   0x9   : > { %p44_p0 = scmp.ne.s32.totalorder %s961_s24, %s957_s23  ;;  %p1257_p1 = scmp.eq.s32.totalorder %s1038_s5, 0 }
   0xa   : > { %p179_p3 = scmp.eq.s32.totalorder %s634_s27, 2  ;;  %p635_p5 = scmp.ge.s32.totalorder %s969_s26, 1 }
   0xb   : > { %p1047_p4 = por %p1257_p1, %p44_p0  ;;  %p186_p7 = scmp.lt.s32.totalorder %s969_s26, 4 }
   0xc   : > { %p1052_p6 = por %p179_p3, %p44_p0  ;;  %s971_s7 = smov [#allocation6]  }
   0xd   : > { %s1260_s28 = scalar_select %p1047_p4, 1, 0 }
   0xe   : > { %s1261_s29 = scalar_select %p1052_p6, 1, 0 }
   0xf   : > { %p1057_p8 = pnand %p635_p5, %p186_p7  ;;  %s198_s8 = sshll.u32 %s971_s7, 4  ;;  %s199_s8 = int_to_ptr.vmem [resolvable:$true] %s198_s8 }
  0x10   : > { %s972_s10 = smov [#allocation8]   ;;  %s813_s14 = scalar_lea.hbm %s1251_s1, 1024 }
  0x11   : > { %s1262_s30 = scalar_select %p1057_p8, 1, 0 }
  0x12   : > { %p738_p9 = pneg %p1057_p8  ;;  %s214_s11 = sshll.u32 %s972_s10, 4  ;;  %s1069_s11 = int_to_ptr.vmem [resolvable:$true] %s214_s11 }
  0x13   : > { %p814_p11 = scmp.ne.s32.totalorder %s1251_s1, %s813_s14  ;;  %p820_p3 = scmp.lt.u32.totalorder %s813_s14, %s1251_s1 }
  0x14   : > { %p1065_p10 = pnand %p738_p9, %p1257_p1 }
  0x16   : > { %p815_p12 = pneg %p1065_p10 }
  0x18   : > { %p816_p13 = pnand %p815_p12, %p814_p11 }
  0x1a   : > { %p817_p0 = pneg %p816_p13 }
  0x1c   : > { %p822_p5 = pnand %p820_p3, %p817_p0 }
  0x1e   : > { %825 = shalt.err (!%p822_p5)
}
  0x1f   : > { %s826_s19 = scalar_lea.vmem %s199_s8, 1024  ;;  %p834_p2 = scmp.lt.s32.totalorder %s199_s8, %s199_s8 }
  0x20   : > { %p827_p7 = scmp.ne.s32.totalorder %s199_s8, %s826_s19  ;;  %p835_p6 = scmp.lt.s32.totalorder %s826_s19, %s826_s19 }
  0x22   : > { %p829_p9 = pnand %p827_p7, %p815_p12  ;;  %p836_p4 = por %p835_p6, %p834_p2 }
  0x24   : > { %p830_p1 = pneg %p829_p9 }
  0x26   : > { %p837_p8 = pnand %p836_p4, %p830_p1 }
  0x28   : > { %840 = shalt.err (!%p837_p8)
}
  0x29   : > { %s973_s20 = smov 64   ;;  %s974_s21 = smov 4  }
  0x2a   : > { %741 = dma.hbm_to_vmem [thread:$0]  (!%p1065_p10), %s1251_s1, 1024, %s199_s8, [#allocation7], %s973_s20, %s973_s20, %s974_s21  }
  0x2b   : > { %s841_s12 = scalar_lea.hbm %s1253_s3, 1024 }
  0x2c   : > { %p842_p11 = scmp.ne.s32.totalorder %s1253_s3, %s841_s12  ;;  %p848_p4 = scmp.lt.u32.totalorder %s841_s12, %s1253_s3 }
  0x2e   : > { %p844_p1 = pnand %p842_p11, %p815_p12 }
  0x30   : > { %p845_p2 = pneg %p844_p1 }
  0x32   : > { %p850_p6 = pnand %p848_p4, %p845_p2 }
  0x34   : > { %853 = shalt.err (!%p850_p6)
}
  0x35   : > { %s854_s8 = scalar_lea.vmem %s1069_s11, 1024  ;;  %p862_p3 = scmp.lt.s32.totalorder %s1069_s11, %s1069_s11 }
  0x36   : > { %p855_p8 = scmp.ne.s32.totalorder %s1069_s11, %s854_s8  ;;  %p863_p5 = scmp.lt.s32.totalorder %s854_s8, %s854_s8 }
  0x38   : > { %p857_p13 = pnand %p855_p8, %p815_p12  ;;  %p864_p7 = por %p863_p5, %p862_p3 }
  0x3a   : > { %p858_p0 = pneg %p857_p13 }
  0x3c   : > { %p865_p9 = pnand %p864_p7, %p858_p0 }
  0x3e   : > { %868 = shalt.err (!%p865_p9)
}
  0x3f   : > { %744 = dma.hbm_to_vmem [thread:$0]  (!%p1065_p10), %s1253_s3, 1024, %s1069_s11, [#allocation7], %s973_s20, %s973_s20, %s974_s21  }
  0x40   : > { %s1119_s19 = sadd.s32 1, %s969_s26   ;;  %s31_s9 = sadd.s32 1, %s965_s25 }
  0x41   : > { %s28_s22 = ssub.s32 %s969_s26, %s1119_s19  ;;  %p38_p12 = scmp.ne.s32.totalorder %s965_s25, %s961_s24 }
  0x42   : > { %p29_p11 = scmp.eq.s32.totalorder %s28_s22, 0  ;;  %p39_p1 = scmp.eq.s32.totalorder %s969_s26, 0 }
  0x43   : > { %p1264_p2 = scmp.eq.s32.totalorder %s1038_s5, 2  ;;  %p755_p6 = scmp.lt.s32.totalorder %s969_s26, 3 }
  0x44   : > { %s1135_s7 = scalar_select %p29_p11, %s965_s25, %s31_s9  }
  0x45   : > { %p1129_p4 = por %p1264_p2, %p38_p12  ;;  %p40_p8 = por %p39_p1, %p38_p12 }
  0x46   : > { %s234_s10 = sand.u32 1, %s965_s25   ;;  %s640_s11 = sshll.u32 %s969_s26, 7 }
  0x47   : > { %s639_s12 = sshll.u32 %s234_s10, 3  ;;  %s1142_s13 = scalar_lea.hbm %s1250_s0, %s640_s11 }
  0x48   : > { %s238_s14 = scalar_lea.vmem [#allocation3], %s639_s12  ;;  %p1146_p10 = pnand %p755_p6, %p40_p8 }
  0x49   : > { %s245_s15 = sshll.u32 %s238_s14, 4  ;;  %s235_s8 = scalar_lea.sflag [#allocation4], %s234_s10  ;;  %s1144_s15 = int_to_ptr.vmem [resolvable:$true] %s245_s15 }
  0x4a   : > { %s869_s17 = scalar_lea.hbm %s1142_s13, 128  ;;  %p871_p0 = pneg %p1146_p10 }
  0x4b   : > { %p870_p13 = scmp.ne.s32.totalorder %s1142_s13, %s869_s17  ;;  %s874_s22 = scalar_lea.hbm %s1250_s0, 384 }
  0x4c   : > { %p875_p7 = scmp.lt.u32.totalorder %s1142_s13, %s1250_s0  ;;  %p876_p9 = scmp.lt.u32.totalorder %s874_s22, %s869_s17 }
  0x4d   : > { %p872_p3 = pnand %p871_p0, %p870_p13  ;;  %p878_p11 = scmp.lt.u32.totalorder %s869_s17, %s1142_s13 }
  0x4e   : > { %p877_p12 = por %p876_p9, %p875_p7 }
  0x4f   : > { %p873_p5 = pneg %p872_p3 }
  0x50   : > { %p879_p1 = por %p878_p11, %p877_p12 }
  0x52   : > { %p880_p2 = pnand %p879_p1, %p873_p5 }
  0x54   : > { %883 = shalt.err (!%p880_p2)
}
  0x55   : > { %s884_s10 = scalar_lea.vmem %s1144_s15, 128  ;;  %s975_s20 = smov [#allocation3]  }
  0x56   : > { %p885_p6 = scmp.ne.s32.totalorder %s1144_s15, %s884_s10  ;;  %s889_s21 = sshll.u32 %s975_s20, 4  ;;  %s890_s21 = int_to_ptr.vmem [resolvable:$false] %s889_s21 }
  0x57   : > { %s891_s14 = scalar_lea.vmem %s890_s21, 256  ;;  %p892_p3 = scmp.lt.s32.totalorder %s1144_s15, %s890_s21 }
  0x58   : > { %p887_p8 = pnand %p885_p6, %p871_p0  ;;  %p893_p7 = scmp.lt.s32.totalorder %s891_s14, %s884_s10 }
  0x5a   : > { %p888_p13 = pneg %p887_p8  ;;  %p894_p9 = por %p893_p7, %p892_p3 }
  0x5c   : > { %p895_p12 = pnand %p894_p9, %p888_p13 }
  0x5e   : > { %898 = shalt.err (!%p895_p12)
}
  0x5f   : > { %748 = dma.hbm_to_vmem [thread:$0]  (!%p1146_p10), %s1142_s13, 128, %s1144_s15, %s235_s8  }
  0x60   : > { %p1267_p5 = scmp.ne.s32.totalorder %s1262_s30, 0 }
  0x61   : > { %s1178_s17 = sand.u32 (!%p1267_p5), 1, %s961_s24   ;;  %p1268_p0 = scmp.ne.s32.totalorder (!%p1267_p5), %s1260_s28, 0 }
  0x62   : > { %254 = sbr.rel (%p1267_p5) target bundleno = 595 (0x253), region = 44  ;;  %s642_s18 = sshll.u32 (!%p1267_p5), %s1178_s17, 3 }
  0x63   : > { %s257_s9 = scalar_lea.sflag (!%p1267_p5), [#allocation4], %s1178_s17  ;;  %s1184_s22 = scalar_lea.vmem (!%p1267_p5), [#allocation3], %s642_s18 }
  0x69   : > { %944 = dma.done.wait (%p1268_p0), %s257_s9, 128  }
  0x6a   : > { %946 = vsyncadd (%p1268_p0), %s257_s9, 4294967168  ;;  %p1269_p10 = scmp.eq.s32.totalorder %s1038_s5, 0 }
  0x6c   : > { %948 = dma.done.wait (%p1269_p10), [#allocation7], 2048   ;;  %p1270_p11 = pmov %p1269_p10 }
  0x6d   : > { %v976_v0 = vmov 0.0   ;;  %vm977_vm0 = vmmov 0   ;;  %v797_v1 = vld [vmem:[#allocation6] sm:$0xff]   ;;  %v798_v2 = vld [vmem:[#allocation6 + $0x8] sm:$0xff]   ;;  %v799_v3 = vld [vmem:[#allocation6 + $0x10] sm:$0xff]   ;;  %s524_s13 = sld [smem:[#allocation2]] }
  0x6e   : > { %950 = vsyncadd (%p1270_p11), [#allocation7], 4294965248  ;;  %686 = vmatprep.subr.bf16.mxu0 %v976_v0  ;;  %702 = vmatprep.mubr.msk.bf16.mxu0 %vm977_vm0, %v976_v0  ;;  %v805_v4 = vld [vmem:[#allocation8] sm:$0xff]   ;;  %v800_v5 = vld [vmem:[#allocation6 + $0x18] sm:$0xff]   ;;  %s665_s12 = sshll.u32 %s1038_s5, 7  ;;  %s296_s11 = scalar_lea.vmem [#allocation9], %s642_s18 }
  0x6f   : > { %706 = vmatprep.subr.bf16.mxu1 %v976_v0  ;;  %722 = vmatprep.mubr.msk.bf16.mxu1 %vm977_vm0, %v976_v0  ;;  %v806_v6 = vld [vmem:[#allocation8 + $0x8] sm:$0xff]   ;;  %v801_v7 = vld [vmem:[#allocation6 + $0x20] sm:$0xff]   ;;  %v807_v8 = vld [vmem:[#allocation8 + $0x10] sm:$0xff]   ;;  %s545_s10 = sshll.u32 %s296_s11, 4  ;;  %s1207_s14 = scalar_lea.hbm %s1256_s6, %s665_s12  ;;  %s1209_s10 = int_to_ptr.vmem [resolvable:$true] %s545_s10 }
  0x70   : > { %687 = vmatpush3.bf16.msra.mxu0 %v797_v1  ;;  %707 = vmatpush3.bf16.msra.mxu1 %v805_v4  ;;  %v802_v9 = vld [vmem:[#allocation6 + $0x28] sm:$0xff]   ;;  %v808_v10 = vld [vmem:[#allocation8 + $0x18] sm:$0xff]   ;;  %v803_v11 = vld [vmem:[#allocation6 + $0x30] sm:$0xff]   ;;  %s532_s9 = scalar_lea.sflag [#allocation5], %s1178_s17  ;;  %s978_s5 = smov [#allocation9]  }
  0x71   : > { %688 = vmatprep.subr.bf16.mxu0 %v976_v0  ;;  %708 = vmatprep.subr.bf16.mxu1 %v976_v0  ;;  %v809_v12 = vld [vmem:[#allocation8 + $0x20] sm:$0xff]   ;;  %v804_v13 = vld [vmem:[#allocation6 + $0x38] sm:$0xff]   ;;  %v810_v15 = vld [vmem:[#allocation8 + $0x28] sm:$0xff]   ;;  %s903_s18 = sshll.u32 %s978_s5, 4  ;;  %s904_s18 = int_to_ptr.vmem [resolvable:$false] %s903_s18 }
  0x72   : > { %v298_v14 = vld [vmem:[%s1184_s22] sm:$0xff]  ;;  %s899_s22 = scalar_lea.vmem %s1209_s10, 128  ;;  %s905_s28 = scalar_lea.vmem %s904_s18, 256 }
  0x73   : > { %v316_v16 = vpack.c.bf16 %v298_v14, %v298_v14  ;;  %v811_v17 = vld [vmem:[#allocation8 + $0x30] sm:$0xff]   ;;  %v812_v18 = vld [vmem:[#allocation8 + $0x38] sm:$0xff]   ;;  %s525_s8 = ssub.f32 1.0, %s524_s13  ;;  %p900_p1 = scmp.ne.s32.totalorder %s1209_s10, %s899_s22 }
  0x74   : > { %689 = vmatpush3.bf16.msra.mxu0 %v798_v2  ;;  %709 = vmatpush3.bf16.msra.mxu1 %v806_v6  ;;  %v646_v19 = vld [vmem:[%s1252_s2] ss:$0 sm:$0xff]  ;;  %p906_p8 = scmp.lt.s32.totalorder %s1209_s10, %s904_s18  ;;  %p907_p13 = scmp.lt.s32.totalorder %s905_s28, %s899_s22 }
  0x75   : > { %690 = vmatprep.subr.bf16.mxu0 %v976_v0  ;;  %710 = vmatprep.subr.bf16.mxu1 %v976_v0  ;;  %v655_v27 = vld [vmem:[%s1254_s4] ss:$0 sm:$0xff]  ;;  %v527_v31 = vstv %s525_s8  ;;  %p901_p2 = pnand %p900_p1, %p1129_p4 }
  0x76   : > { %p908_p3 = por %p907_p13, %p906_p8 }
  0x77   : > { %p902_p6 = pneg %p901_p2 }
  0x78   : > { %691 = vmatpush3.bf16.msra.mxu0 %v799_v3  ;;  %711 = vmatpush3.bf16.msra.mxu1 %v807_v8 }
  0x79   : > { %692 = vmatprep.subr.bf16.mxu0 %v976_v0  ;;  %712 = vmatprep.subr.bf16.mxu1 %v976_v0  ;;  %p909_p7 = pnand %p908_p3, %p902_p6 }
  0x7c   : > { %693 = vmatpush3.bf16.msra.mxu0 %v800_v5  ;;  %713 = vmatpush3.bf16.msra.mxu1 %v808_v10 }
  0x7d   : > { %694 = vmatprep.subr.bf16.mxu0 %v976_v0  ;;  %714 = vmatprep.subr.bf16.mxu1 %v976_v0 }
  0x80   : > { %695 = vmatpush3.bf16.msra.mxu0 %v801_v7  ;;  %715 = vmatpush3.bf16.msra.mxu1 %v809_v12 }
  0x81   : > { %696 = vmatprep.subr.bf16.mxu0 %v976_v0  ;;  %716 = vmatprep.subr.bf16.mxu1 %v976_v0 }
  0x84   : > { %697 = vmatpush3.bf16.msra.mxu0 %v802_v9  ;;  %717 = vmatpush3.bf16.msra.mxu1 %v810_v15 }
  0x85   : > { %698 = vmatprep.subr.bf16.mxu0 %v976_v0  ;;  %718 = vmatprep.subr.bf16.mxu1 %v976_v0 }
  0x88   : > { %699 = vmatpush3.bf16.msra.mxu0 %v803_v11  ;;  %719 = vmatpush3.bf16.msra.mxu1 %v811_v17 }
  0x89   : > { %700 = vmatprep.subr.bf16.mxu0 %v976_v0  ;;  %720 = vmatprep.subr.bf16.mxu1 %v976_v0 }
  0x8c   : > { %701 = vmatpush3.bf16.msra.mxu0 %v804_v13  ;;  %721 = vmatpush3.bf16.msra.mxu1 %v812_v18 }
  0x8f   : > { %703 = vmatmul.mubr.bf16.vlgmr.msra.gmra.mrb[0].mxu0 %v316_v16 }
 0x162   : > { %v405_v20 = vpop.f32.mrb[0].mxu0 }
 0x163   : > { %v406_v21 = vadd.f32 %v646_v19, %v405_v20  ;;  %v704_v22 = vpop.f32.mrb[1].mxu0 }
 0x164   : > { %v408_v23 = vpop.f32.mrb[2].mxu0 }
 0x165   : > { %v411_v24 = vmax.f32 %v406_v21, 0.0  ;;  %v705_v25 = vpop.f32.mrb[3].mxu0 }
 0x167   : > { %v429_v26 = vpack.c.bf16 %v411_v24, %v411_v24 }
 0x169   : > { %723 = vmatmul.mubr.bf16.vlgmr.msra.gmra.mrb[0].mxu1 %v429_v26 }
 0x23c   : > { %v518_v28 = vpop.f32.mrb[0].mxu1 }
 0x23d   : > { %v519_v29 = vadd.f32 %v655_v27, %v518_v28  ;;  %v724_v30 = vpop.f32.mrb[1].mxu1 }
 0x23e   : > { %v521_v32 = vpop.f32.mrb[2].mxu1 }
 0x23f   : > { %v526_v33 = vsub.f32 %v519_v29, %v298_v14  ;;  %v725_v34 = vpop.f32.mrb[3].mxu1 }
 0x241   : > { %v528_v35 = vmul.f32 %v527_v31, %v526_v33 }
 0x243   : > { %v529_v36 = vadd.f32 %v528_v35, %v298_v14 }
 0x245   : > { %530 = vst [vmem:[%s296_s11] sm:$0xff] %v529_v36 }
 0x246   : > { %912 = shalt.err (!%p909_p7)
}
 0x247   : > { %s913_s17 = scalar_lea.hbm %s1207_s14, 128  ;;  %s917_s15 = scalar_lea.hbm %s1256_s6, 384 }
 0x248   : > { %p914_p9 = scmp.ne.s32.totalorder %s1207_s14, %s913_s17  ;;  %p918_p0 = scmp.lt.u32.totalorder %s1207_s14, %s1256_s6 }
 0x249   : > { %p919_p10 = scmp.lt.u32.totalorder %s917_s15, %s913_s17  ;;  %p921_p1 = scmp.lt.u32.totalorder %s913_s17, %s1207_s14 }
 0x24a   : > { %p915_p12 = pnand %p914_p9, %p1129_p4 }
 0x24b   : > { %p920_p11 = por %p919_p10, %p918_p0 }
 0x24c   : > { %p916_p5 = pneg %p915_p12 }
 0x24d   : > { %p922_p2 = por %p921_p1, %p920_p11 }
 0x24f   : > { %p923_p6 = pnand %p922_p2, %p916_p5 }
 0x251   : > { %926 = shalt.err (!%p923_p6)
}
 0x252   : > { %736 = dma.vmem_to_hbm [thread:$0]  (%p1129_p4), %s1209_s10, 128, %s1207_s14, %s532_s9  }
 0x253 PF: > { %p758_p8 = scmp.ge.s32.totalorder %s969_s26, 2  ;;  %s557_s12 = sand.u32 1, %s957_s23  }
 0x254   : > { %p1271_p13 = scmp.ne.s32.totalorder %s1261_s29, 0  ;;  %s558_s11 = scalar_lea.sflag [#allocation5], %s557_s12 }
 0x256   : > { %p750_p3 = pnand %p758_p8, %p1271_p13 }
 0x258   : > { %952 = dma.done.wait (!%p750_p3), %s558_s11, 128  }
 0x259   : > { %954 = vsyncadd (!%p750_p3), %s558_s11, 4294967168  ;;  %p21_p7 = scmp.ge.s32.totalorder %s1119_s19, 5   ;;  %s1272_s23 = smov %s961_s24 }
 0x25a   : > { %s1273_s24 = smov %s965_s25  ;;  %s1274_s25 = smov %s1135_s7 }
 0x25b   : > { %s1275_s26 = smov %s1119_s19  ;;  %23 = sbr.rel (!%p21_p7) target bundleno = 8 (0x8), region = 97 }
 0x262   :  { %563 = vsyncpa [#allocation4], 1 }
 0x263   :  { %565 = vsyncpa [#allocation4 + $0x1], 1 }
 0x264   :  { %566 = vsyncpa [#allocation7], 1 }
 0x265   :  { %567 = vsyncpa [#allocation5], 1 }
 0x266   :  { %569 = vsyncpa [#allocation5 + $0x1], 1 }

// kernel: tpu_custom_call.1
= control target key start
LH: loop header
LB: loop body
LE: loop exit
PB: predicated region body
PF: predicated region fallthrough
CT: control target
= control target key end

     0   :  { %s1250_s0 = inlined_call_operand.hbm [shape: f32[20,128], index: 0, kind: input, shape index: {}]   ;;  %s1251_s1 = inlined_call_operand.hbm [shape: bf16[128,128], index: 1, kind: input, shape index: {}]   ;;  %s1252_s2 = inlined_call_operand.vmem [shape: f32[1,128], index: 2, kind: input, shape index: {}]   ;;  %s1253_s3 = inlined_call_operand.hbm [shape: bf16[128,128], index: 3, kind: input, shape index: {}]   ;;  %s1254_s4 = inlined_call_operand.vmem [shape: f32[1,128], index: 4, kind: input, shape index: {}]   ;;  %s1255_s5 = inlined_call_operand.<no memory space> [shape: f32[1], index: 5, kind: input, shape index: {}]   ;;  %s1256_s6 = inlined_call_operand.hbm [shape: f32[20,128], index: 6, kind: output, shape index: {}]  }
   0x1   :  { %11 = sst [smem:[#allocation2]] %s1255_s5 }
   0x2   :  { %12 = vsyncpa [#allocation4], 0 }
   0x3   :  { %14 = vsyncpa [#allocation4 + $0x1], 0 }
   0x4   :  { %15 = vsyncpa [#allocation7], 0 }
   0x5   :  { %16 = vsyncpa [#allocation5], 0 }
   0x6   :  { %18 = vsyncpa [#allocation5 + $0x1], 0  ;;  %s1017_s23 = smov 0   ;;  %s1019_s24 = smov 0  }
   0x7   :  { %s1021_s25 = smov 0   ;;  %s1023_s26 = smov 0  }
   0x8 LB: > { %s1038_s5 = sadd.s32 4294967295, %s969_s26   ;;  %s634_s27 = sadd.s32 4294967294, %s969_s26   ;;  %s969_s26 = sphi %s1023_s26, %s1275_s26   ;;  %s965_s25 = sphi %s1021_s25, %s1274_s25   ;;  %s961_s24 = sphi %s1019_s24, %s1273_s24   ;;  %s957_s23 = sphi %s1017_s23, %s1272_s23  }
   0x9   : > { %p44_p0 = scmp.ne.s32.totalorder %s961_s24, %s957_s23  ;;  %p1257_p1 = scmp.eq.s32.totalorder %s1038_s5, 0 }
   0xa   : > { %p179_p3 = scmp.eq.s32.totalorder %s634_s27, 2  ;;  %p635_p5 = scmp.ge.s32.totalorder %s969_s26, 1 }
   0xb   : > { %p1047_p4 = por %p1257_p1, %p44_p0  ;;  %p186_p7 = scmp.lt.s32.totalorder %s969_s26, 4 }
   0xc   : > { %p1052_p6 = por %p179_p3, %p44_p0  ;;  %s971_s7 = smov [#allocation6]  }
   0xd   : > { %s1260_s28 = scalar_select %p1047_p4, 1, 0 }
   0xe   : > { %s1261_s29 = scalar_select %p1052_p6, 1, 0 }
   0xf   : > { %p1057_p8 = pnand %p635_p5, %p186_p7  ;;  %s198_s8 = sshll.u32 %s971_s7, 4  ;;  %s199_s8 = int_to_ptr.vmem [resolvable:$true] %s198_s8 }
  0x10   : > { %s972_s10 = smov [#allocation8]   ;;  %s813_s14 = scalar_lea.hbm %s1251_s1, 1024 }
  0x11   : > { %s1262_s30 = scalar_select %p1057_p8, 1, 0 }
  0x12   : > { %p738_p9 = pneg %p1057_p8  ;;  %s214_s11 = sshll.u32 %s972_s10, 4  ;;  %s1069_s11 = int_to_ptr.vmem [resolvable:$true] %s214_s11 }
  0x13   : > { %p814_p11 = scmp.ne.s32.totalorder %s1251_s1, %s813_s14  ;;  %p820_p3 = scmp.lt.u32.totalorder %s813_s14, %s1251_s1 }
  0x14   : > { %p1065_p10 = pnand %p738_p9, %p1257_p1 }
  0x16   : > { %p815_p12 = pneg %p1065_p10 }
  0x18   : > { %p816_p13 = pnand %p815_p12, %p814_p11 }
  0x1a   : > { %p817_p0 = pneg %p816_p13 }
  0x1c   : > { %p822_p5 = pnand %p820_p3, %p817_p0 }
  0x1e   : > { %825 = shalt.err (!%p822_p5)
}
  0x1f   : > { %s826_s19 = scalar_lea.vmem %s199_s8, 1024  ;;  %p834_p2 = scmp.lt.s32.totalorder %s199_s8, %s199_s8 }
  0x20   : > { %p827_p7 = scmp.ne.s32.totalorder %s199_s8, %s826_s19  ;;  %p835_p6 = scmp.lt.s32.totalorder %s826_s19, %s826_s19 }
  0x22   : > { %p829_p9 = pnand %p827_p7, %p815_p12  ;;  %p836_p4 = por %p835_p6, %p834_p2 }
  0x24   : > { %p830_p1 = pneg %p829_p9 }
  0x26   : > { %p837_p8 = pnand %p836_p4, %p830_p1 }
  0x28   : > { %840 = shalt.err (!%p837_p8)
}
  0x29   : > { %s973_s20 = smov 64   ;;  %s974_s21 = smov 4  }
  0x2a   : > { %741 = dma.hbm_to_vmem [thread:$0]  (!%p1065_p10), %s1251_s1, 1024, %s199_s8, [#allocation7], %s973_s20, %s973_s20, %s974_s21  }
  0x2b   : > { %s841_s12 = scalar_lea.hbm %s1253_s3, 1024 }
  0x2c   : > { %p842_p11 = scmp.ne.s32.totalorder %s1253_s3, %s841_s12  ;;  %p848_p4 = scmp.lt.u32.totalorder %s841_s12, %s1253_s3 }
  0x2e   : > { %p844_p1 = pnand %p842_p11, %p815_p12 }
  0x30   : > { %p845_p2 = pneg %p844_p1 }
  0x32   : > { %p850_p6 = pnand %p848_p4, %p845_p2 }
  0x34   : > { %853 = shalt.err (!%p850_p6)
}
  0x35   : > { %s854_s8 = scalar_lea.vmem %s1069_s11, 1024  ;;  %p862_p3 = scmp.lt.s32.totalorder %s1069_s11, %s1069_s11 }
  0x36   : > { %p855_p8 = scmp.ne.s32.totalorder %s1069_s11, %s854_s8  ;;  %p863_p5 = scmp.lt.s32.totalorder %s854_s8, %s854_s8 }
  0x38   : > { %p857_p13 = pnand %p855_p8, %p815_p12  ;;  %p864_p7 = por %p863_p5, %p862_p3 }
  0x3a   : > { %p858_p0 = pneg %p857_p13 }
  0x3c   : > { %p865_p9 = pnand %p864_p7, %p858_p0 }
  0x3e   : > { %868 = shalt.err (!%p865_p9)
}
  0x3f   : > { %744 = dma.hbm_to_vmem [thread:$0]  (!%p1065_p10), %s1253_s3, 1024, %s1069_s11, [#allocation7], %s973_s20, %s973_s20, %s974_s21  }
  0x40   : > { %s1119_s19 = sadd.s32 1, %s969_s26   ;;  %s31_s9 = sadd.s32 1, %s965_s25 }
  0x41   : > { %s28_s22 = ssub.s32 %s969_s26, %s1119_s19  ;;  %p38_p12 = scmp.ne.s32.totalorder %s965_s25, %s961_s24 }
  0x42   : > { %p29_p11 = scmp.eq.s32.totalorder %s28_s22, 0  ;;  %p39_p1 = scmp.eq.s32.totalorder %s969_s26, 0 }
  0x43   : > { %p1264_p2 = scmp.eq.s32.totalorder %s1038_s5, 2  ;;  %p755_p6 = scmp.lt.s32.totalorder %s969_s26, 3 }
  0x44   : > { %s1135_s7 = scalar_select %p29_p11, %s965_s25, %s31_s9  }
  0x45   : > { %p1129_p4 = por %p1264_p2, %p38_p12  ;;  %p40_p8 = por %p39_p1, %p38_p12 }
  0x46   : > { %s234_s10 = sand.u32 1, %s965_s25   ;;  %s640_s11 = sshll.u32 %s969_s26, 7 }
  0x47   : > { %s639_s12 = sshll.u32 %s234_s10, 3  ;;  %s1142_s13 = scalar_lea.hbm %s1250_s0, %s640_s11 }
  0x48   : > { %s238_s14 = scalar_lea.vmem [#allocation3], %s639_s12  ;;  %p1146_p10 = pnand %p755_p6, %p40_p8 }
  0x49   : > { %s245_s15 = sshll.u32 %s238_s14, 4  ;;  %s235_s8 = scalar_lea.sflag [#allocation4], %s234_s10  ;;  %s1144_s15 = int_to_ptr.vmem [resolvable:$true] %s245_s15 }
  0x4a   : > { %s869_s17 = scalar_lea.hbm %s1142_s13, 128  ;;  %p871_p0 = pneg %p1146_p10 }
  0x4b   : > { %p870_p13 = scmp.ne.s32.totalorder %s1142_s13, %s869_s17  ;;  %s874_s22 = scalar_lea.hbm %s1250_s0, 384 }
  0x4c   : > { %p875_p7 = scmp.lt.u32.totalorder %s1142_s13, %s1250_s0  ;;  %p876_p9 = scmp.lt.u32.totalorder %s874_s22, %s869_s17 }
  0x4d   : > { %p872_p3 = pnand %p871_p0, %p870_p13  ;;  %p878_p11 = scmp.lt.u32.totalorder %s869_s17, %s1142_s13 }
  0x4e   : > { %p877_p12 = por %p876_p9, %p875_p7 }
  0x4f   : > { %p873_p5 = pneg %p872_p3 }
  0x50   : > { %p879_p1 = por %p878_p11, %p877_p12 }
  0x52   : > { %p880_p2 = pnand %p879_p1, %p873_p5 }
  0x54   : > { %883 = shalt.err (!%p880_p2)
}
  0x55   : > { %s884_s10 = scalar_lea.vmem %s1144_s15, 128  ;;  %s975_s20 = smov [#allocation3]  }
  0x56   : > { %p885_p6 = scmp.ne.s32.totalorder %s1144_s15, %s884_s10  ;;  %s889_s21 = sshll.u32 %s975_s20, 4  ;;  %s890_s21 = int_to_ptr.vmem [resolvable:$false] %s889_s21 }
  0x57   : > { %s891_s14 = scalar_lea.vmem %s890_s21, 256  ;;  %p892_p3 = scmp.lt.s32.totalorder %s1144_s15, %s890_s21 }
  0x58   : > { %p887_p8 = pnand %p885_p6, %p871_p0  ;;  %p893_p7 = scmp.lt.s32.totalorder %s891_s14, %s884_s10 }
  0x5a   : > { %p888_p13 = pneg %p887_p8  ;;  %p894_p9 = por %p893_p7, %p892_p3 }
  0x5c   : > { %p895_p12 = pnand %p894_p9, %p888_p13 }
  0x5e   : > { %898 = shalt.err (!%p895_p12)
}
  0x5f   : > { %748 = dma.hbm_to_vmem [thread:$0]  (!%p1146_p10), %s1142_s13, 128, %s1144_s15, %s235_s8  }
  0x60   : > { %p1267_p5 = scmp.ne.s32.totalorder %s1262_s30, 0 }
  0x61   : > { %s1178_s17 = sand.u32 (!%p1267_p5), 1, %s961_s24   ;;  %p1268_p0 = scmp.ne.s32.totalorder (!%p1267_p5), %s1260_s28, 0 }
  0x62   : > { %254 = sbr.rel (%p1267_p5) target bundleno = 595 (0x253), region = 44  ;;  %s642_s18 = sshll.u32 (!%p1267_p5), %s1178_s17, 3 }
  0x63   : > { %s257_s9 = scalar_lea.sflag (!%p1267_p5), [#allocation4], %s1178_s17  ;;  %s1184_s22 = scalar_lea.vmem (!%p1267_p5), [#allocation3], %s642_s18 }
  0x69   : > { %944 = dma.done.wait (%p1268_p0), %s257_s9, 128  }
  0x6a   : > { %946 = vsyncadd (%p1268_p0), %s257_s9, 4294967168  ;;  %p1269_p10 = scmp.eq.s32.totalorder %s1038_s5, 0 }
  0x6c   : > { %948 = dma.done.wait (%p1269_p10), [#allocation7], 2048   ;;  %p1270_p11 = pmov %p1269_p10 }
  0x6d   : > { %v976_v0 = vmov 0.0   ;;  %vm977_vm0 = vmmov 0   ;;  %v797_v1 = vld [vmem:[#allocation6] sm:$0xff]   ;;  %v798_v2 = vld [vmem:[#allocation6 + $0x8] sm:$0xff]   ;;  %v799_v3 = vld [vmem:[#allocation6 + $0x10] sm:$0xff]   ;;  %s524_s13 = sld [smem:[#allocation2]] }
  0x6e   : > { %950 = vsyncadd (%p1270_p11), [#allocation7], 4294965248  ;;  %686 = vmatprep.subr.bf16.mxu0 %v976_v0  ;;  %702 = vmatprep.mubr.msk.bf16.mxu0 %vm977_vm0, %v976_v0  ;;  %v805_v4 = vld [vmem:[#allocation8] sm:$0xff]   ;;  %v800_v5 = vld [vmem:[#allocation6 + $0x18] sm:$0xff]   ;;  %s665_s12 = sshll.u32 %s1038_s5, 7  ;;  %s296_s11 = scalar_lea.vmem [#allocation9], %s642_s18 }
  0x6f   : > { %706 = vmatprep.subr.bf16.mxu1 %v976_v0  ;;  %722 = vmatprep.mubr.msk.bf16.mxu1 %vm977_vm0, %v976_v0  ;;  %v806_v6 = vld [vmem:[#allocation8 + $0x8] sm:$0xff]   ;;  %v801_v7 = vld [vmem:[#allocation6 + $0x20] sm:$0xff]   ;;  %v807_v8 = vld [vmem:[#allocation8 + $0x10] sm:$0xff]   ;;  %s545_s10 = sshll.u32 %s296_s11, 4  ;;  %s1207_s14 = scalar_lea.hbm %s1256_s6, %s665_s12  ;;  %s1209_s10 = int_to_ptr.vmem [resolvable:$true] %s545_s10 }
  0x70   : > { %687 = vmatpush3.bf16.msra.mxu0 %v797_v1  ;;  %707 = vmatpush3.bf16.msra.mxu1 %v805_v4  ;;  %v802_v9 = vld [vmem:[#allocation6 + $0x28] sm:$0xff]   ;;  %v808_v10 = vld [vmem:[#allocation8 + $0x18] sm:$0xff]   ;;  %v803_v11 = vld [vmem:[#allocation6 + $0x30] sm:$0xff]   ;;  %s532_s9 = scalar_lea.sflag [#allocation5], %s1178_s17  ;;  %s978_s5 = smov [#allocation9]  }
  0x71   : > { %688 = vmatprep.subr.bf16.mxu0 %v976_v0  ;;  %708 = vmatprep.subr.bf16.mxu1 %v976_v0  ;;  %v809_v12 = vld [vmem:[#allocation8 + $0x20] sm:$0xff]   ;;  %v804_v13 = vld [vmem:[#allocation6 + $0x38] sm:$0xff]   ;;  %v810_v15 = vld [vmem:[#allocation8 + $0x28] sm:$0xff]   ;;  %s903_s18 = sshll.u32 %s978_s5, 4  ;;  %s904_s18 = int_to_ptr.vmem [resolvable:$false] %s903_s18 }
  0x72   : > { %v298_v14 = vld [vmem:[%s1184_s22] sm:$0xff]  ;;  %s899_s22 = scalar_lea.vmem %s1209_s10, 128  ;;  %s905_s28 = scalar_lea.vmem %s904_s18, 256 }
  0x73   : > { %v316_v16 = vpack.c.bf16 %v298_v14, %v298_v14  ;;  %v811_v17 = vld [vmem:[#allocation8 + $0x30] sm:$0xff]   ;;  %v812_v18 = vld [vmem:[#allocation8 + $0x38] sm:$0xff]   ;;  %s525_s8 = ssub.f32 1.0, %s524_s13  ;;  %p900_p1 = scmp.ne.s32.totalorder %s1209_s10, %s899_s22 }
  0x74   : > { %689 = vmatpush3.bf16.msra.mxu0 %v798_v2  ;;  %709 = vmatpush3.bf16.msra.mxu1 %v806_v6  ;;  %v646_v19 = vld [vmem:[%s1252_s2] ss:$0 sm:$0xff]  ;;  %p906_p8 = scmp.lt.s32.totalorder %s1209_s10, %s904_s18  ;;  %p907_p13 = scmp.lt.s32.totalorder %s905_s28, %s899_s22 }
  0x75   : > { %690 = vmatprep.subr.bf16.mxu0 %v976_v0  ;;  %710 = vmatprep.subr.bf16.mxu1 %v976_v0  ;;  %v655_v27 = vld [vmem:[%s1254_s4] ss:$0 sm:$0xff]  ;;  %v527_v31 = vstv %s525_s8  ;;  %p901_p2 = pnand %p900_p1, %p1129_p4 }
  0x76   : > { %p908_p3 = por %p907_p13, %p906_p8 }
  0x77   : > { %p902_p6 = pneg %p901_p2 }
  0x78   : > { %691 = vmatpush3.bf16.msra.mxu0 %v799_v3  ;;  %711 = vmatpush3.bf16.msra.mxu1 %v807_v8 }
  0x79   : > { %692 = vmatprep.subr.bf16.mxu0 %v976_v0  ;;  %712 = vmatprep.subr.bf16.mxu1 %v976_v0  ;;  %p909_p7 = pnand %p908_p3, %p902_p6 }
  0x7c   : > { %693 = vmatpush3.bf16.msra.mxu0 %v800_v5  ;;  %713 = vmatpush3.bf16.msra.mxu1 %v808_v10 }
  0x7d   : > { %694 = vmatprep.subr.bf16.mxu0 %v976_v0  ;;  %714 = vmatprep.subr.bf16.mxu1 %v976_v0 }
  0x80   : > { %695 = vmatpush3.bf16.msra.mxu0 %v801_v7  ;;  %715 = vmatpush3.bf16.msra.mxu1 %v809_v12 }
  0x81   : > { %696 = vmatprep.subr.bf16.mxu0 %v976_v0  ;;  %716 = vmatprep.subr.bf16.mxu1 %v976_v0 }
  0x84   : > { %697 = vmatpush3.bf16.msra.mxu0 %v802_v9  ;;  %717 = vmatpush3.bf16.msra.mxu1 %v810_v15 }
  0x85   : > { %698 = vmatprep.subr.bf16.mxu0 %v976_v0  ;;  %718 = vmatprep.subr.bf16.mxu1 %v976_v0 }
  0x88   : > { %699 = vmatpush3.bf16.msra.mxu0 %v803_v11  ;;  %719 = vmatpush3.bf16.msra.mxu1 %v811_v17 }
  0x89   : > { %700 = vmatprep.subr.bf16.mxu0 %v976_v0  ;;  %720 = vmatprep.subr.bf16.mxu1 %v976_v0 }
  0x8c   : > { %701 = vmatpush3.bf16.msra.mxu0 %v804_v13  ;;  %721 = vmatpush3.bf16.msra.mxu1 %v812_v18 }
  0x8f   : > { %703 = vmatmul.mubr.bf16.vlgmr.msra.gmra.mrb[0].mxu0 %v316_v16 }
 0x162   : > { %v405_v20 = vpop.f32.mrb[0].mxu0 }
 0x163   : > { %v406_v21 = vadd.f32 %v646_v19, %v405_v20  ;;  %v704_v22 = vpop.f32.mrb[1].mxu0 }
 0x164   : > { %v408_v23 = vpop.f32.mrb[2].mxu0 }
 0x165   : > { %v411_v24 = vmax.f32 %v406_v21, 0.0  ;;  %v705_v25 = vpop.f32.mrb[3].mxu0 }
 0x167   : > { %v429_v26 = vpack.c.bf16 %v411_v24, %v411_v24 }
 0x169   : > { %723 = vmatmul.mubr.bf16.vlgmr.msra.gmra.mrb[0].mxu1 %v429_v26 }
 0x23c   : > { %v518_v28 = vpop.f32.mrb[0].mxu1 }
 0x23d   : > { %v519_v29 = vadd.f32 %v655_v27, %v518_v28  ;;  %v724_v30 = vpop.f32.mrb[1].mxu1 }
 0x23e   : > { %v521_v32 = vpop.f32.mrb[2].mxu1 }
 0x23f   : > { %v526_v33 = vsub.f32 %v519_v29, %v298_v14  ;;  %v725_v34 = vpop.f32.mrb[3].mxu1 }
 0x241   : > { %v528_v35 = vmul.f32 %v527_v31, %v526_v33 }
 0x243   : > { %v529_v36 = vadd.f32 %v528_v35, %v298_v14 }
 0x245   : > { %530 = vst [vmem:[%s296_s11] sm:$0xff] %v529_v36 }
 0x246   : > { %912 = shalt.err (!%p909_p7)
}
 0x247   : > { %s913_s17 = scalar_lea.hbm %s1207_s14, 128  ;;  %s917_s15 = scalar_lea.hbm %s1256_s6, 384 }
 0x248   : > { %p914_p9 = scmp.ne.s32.totalorder %s1207_s14, %s913_s17  ;;  %p918_p0 = scmp.lt.u32.totalorder %s1207_s14, %s1256_s6 }
 0x249   : > { %p919_p10 = scmp.lt.u32.totalorder %s917_s15, %s913_s17  ;;  %p921_p1 = scmp.lt.u32.totalorder %s913_s17, %s1207_s14 }
 0x24a   : > { %p915_p12 = pnand %p914_p9, %p1129_p4 }
 0x24b   : > { %p920_p11 = por %p919_p10, %p918_p0 }
 0x24c   : > { %p916_p5 = pneg %p915_p12 }
 0x24d   : > { %p922_p2 = por %p921_p1, %p920_p11 }
 0x24f   : > { %p923_p6 = pnand %p922_p2, %p916_p5 }
 0x251   : > { %926 = shalt.err (!%p923_p6)
}
 0x252   : > { %736 = dma.vmem_to_hbm [thread:$0]  (%p1129_p4), %s1209_s10, 128, %s1207_s14, %s532_s9  }
 0x253 PF: > { %p758_p8 = scmp.ge.s32.totalorder %s969_s26, 2  ;;  %s557_s12 = sand.u32 1, %s957_s23  }
 0x254   : > { %p1271_p13 = scmp.ne.s32.totalorder %s1261_s29, 0  ;;  %s558_s11 = scalar_lea.sflag [#allocation5], %s557_s12 }
 0x256   : > { %p750_p3 = pnand %p758_p8, %p1271_p13 }
 0x258   : > { %952 = dma.done.wait (!%p750_p3), %s558_s11, 128  }
 0x259   : > { %954 = vsyncadd (!%p750_p3), %s558_s11, 4294967168  ;;  %p21_p7 = scmp.ge.s32.totalorder %s1119_s19, 5   ;;  %s1272_s23 = smov %s961_s24 }
 0x25a   : > { %s1273_s24 = smov %s965_s25  ;;  %s1274_s25 = smov %s1135_s7 }
 0x25b   : > { %s1275_s26 = smov %s1119_s19  ;;  %23 = sbr.rel (!%p21_p7) target bundleno = 8 (0x8), region = 97 }
 0x262   :  { %563 = vsyncpa [#allocation4], 1 }
 0x263   :  { %565 = vsyncpa [#allocation4 + $0x1], 1 }
 0x264   :  { %566 = vsyncpa [#allocation7], 1 }
 0x265   :  { %567 = vsyncpa [#allocation5], 1 }
 0x266   :  { %569 = vsyncpa [#allocation5 + $0x1], 1 }

</bundles_post_ra>
